<compile_context>
chip_gen: v7x
topology: tpu7x:2x2x1
jax: 0.10.0
libtpu: 0.0.40
codegen_flags: <defaults>
</compile_context>

<pallas_src>
import jax
import jax.numpy as jnp
from jax.experimental import pallas as pl
from jax.experimental.pallas import tpu as pltpu

INPUT_SIZE = 15
HIDDEN_SIZE = 32
OUTPUT_SIZE = 4


def _round_up(x, m):
    return ((x + m - 1) // m) * m


def mlp_kernel(x_ref, w1_ref, b1_ref, w2_ref, b2_ref, o_ref):
    # hidden = relu(x @ W1 + b1); MXU matmuls on bf16 operands, f32 accumulate.
    x_bf = x_ref[...].astype(jnp.bfloat16)
    h = jnp.dot(x_bf, w1_ref[...], preferred_element_type=jnp.float32)
    h = h + b1_ref[...]          # f32 (TB, HID) + (1, HID) broadcast
    h = jnp.maximum(h, 0.0)      # ReLU, f32 on the VPU (v5e-safe)
    # Dropout: identity in eval/inference mode.
    y = jnp.dot(h.astype(jnp.bfloat16), w2_ref[...],
                preferred_element_type=jnp.float32)
    y = y + b2_ref[...]          # final layer is Identity
    o_ref[...] = y.astype(o_ref.dtype)


def simple_regression_mlp(x, w1, b1, w2, b2, *, tile_b=1024):
    """x: (B, INPUT_SIZE) float32; weights stored (in, out). Returns (B, OUT) f32."""
    B, IN = x.shape
    assert IN == INPUT_SIZE
    HID = w1.shape[1]
    OUT = w2.shape[1]

    # --- choose a batch tile: multiple of 8, no bigger than needed, and try to
    # keep >= 2 grid steps so the parallel axis can shard across v7x's 2 TCs.
    tile_b = max(8, (min(tile_b, _round_up(B, 8)) // 8) * 8)
    if B > 8 and _round_up(B, tile_b) // tile_b < 2:
        tile_b = max(8, _round_up(pl.cdiv(B, 2), 8))
    b_pad = _round_up(B, tile_b)

    # --- pad batch remainder with zeros (extra rows computed then discarded).
    if b_pad != B:
        x = jnp.pad(x, ((0, b_pad - B), (0, 0)))

    # --- weights as bf16 once (cuts MXU multi-pass count ~3x on bf16 MXUs);
    # biases stay f32 for the f32 epilogue.
    w1_bf = w1.astype(jnp.bfloat16)
    w2_bf = w2.astype(jnp.bfloat16)
    b1_f32 = b1.reshape(1, HID).astype(jnp.float32)
    b2_f32 = b2.reshape(1, OUT).astype(jnp.float32)

    grid = (b_pad // tile_b,)
    out = pl.pallas_call(
        mlp_kernel,
        out_shape=jax.ShapeDtypeStruct((b_pad, OUT), jnp.float32),
        grid_spec=pltpu.PrefetchScalarGridSpec(
            num_scalar_prefetch=0,
            grid=grid,
            in_specs=[
                pl.BlockSpec((tile_b, IN), lambda i: (i, 0)),   # x tile (f32)
                pl.BlockSpec((IN, HID),    lambda i: (0, 0)),   # W1 (bf16, resident)
                pl.BlockSpec((1, HID),     lambda i: (0, 0)),   # b1 (f32)
                pl.BlockSpec((HID, OUT),   lambda i: (0, 0)),   # W2 (bf16, resident)
                pl.BlockSpec((1, OUT),     lambda i: (0, 0)),   # b2 (f32)
            ],
            out_specs=pl.BlockSpec((tile_b, OUT), lambda i: (i, 0)),
        ),
        compiler_params=pltpu.CompilerParams(
            dimension_semantics=("parallel",)),
    )(x, w1_bf, b1_f32, w2_bf, b2_f32)

    return out[:B]


def init_params(key):
    """Deterministic init mimicking nn.Linear (uniform in +-1/sqrt(fan_in))."""
    k1, k2, k3, k4 = jax.random.split(key, 4)
    lim1 = 1.0 / jnp.sqrt(INPUT_SIZE)
    lim2 = 1.0 / jnp.sqrt(HIDDEN_SIZE)
    # Stored as (in, out) == transpose of PyTorch's (out, in) weight layout.
    w1 = jax.random.uniform(k1, (INPUT_SIZE, HIDDEN_SIZE), jnp.float32, -lim1, lim1)
    b1 = jax.random.uniform(k2, (1, HIDDEN_SIZE), jnp.float32, -lim1, lim1)
    w2 = jax.random.uniform(k3, (HIDDEN_SIZE, OUTPUT_SIZE), jnp.float32, -lim2, lim2)
    b2 = jax.random.uniform(k4, (1, OUTPUT_SIZE), jnp.float32, -lim2, lim2)
    return w1, b1, w2, b2


def reference_f32(x, w1, b1, w2, b2):
    h = jnp.maximum(x @ w1 + b1, 0.0)
    return h @ w2 + b2


if __name__ == "__main__":
    key = jax.random.PRNGKey(0)
    kx, kp = jax.random.split(key)
    w1, b1, w2, b2 = init_params(kp)

    # Small check #1: B=16 -> tile_b=8, 2 parallel grid steps.
    B = 16
    x = jax.random.normal(kx, (B, INPUT_SIZE), jnp.float32)
    out = jax.block_until_ready(simple_regression_mlp(x, w1, b1, w2, b2))
    ref = reference_f32(x, w1, b1, w2, b2)
    assert out.shape == (B, OUTPUT_SIZE)
    # bf16 matmul operands -> loose tolerance vs. the f32 reference.
    assert jnp.allclose(out, ref, atol=5e-2, rtol=5e-2), \
        float(jnp.max(jnp.abs(out - ref)))

    # Small check #2: non-multiple-of-8 batch exercises the padding path.
    B2 = 20
    x2 = jax.random.normal(jax.random.PRNGKey(1), (B2, INPUT_SIZE), jnp.float32)
    out2 = jax.block_until_ready(simple_regression_mlp(x2, w1, b1, w2, b2))
    ref2 = reference_f32(x2, w1, b1, w2, b2)
    assert out2.shape == (B2, OUTPUT_SIZE)
    assert jnp.allclose(out2, ref2, atol=5e-2, rtol=5e-2), \
        float(jnp.max(jnp.abs(out2 - ref2)))

    print("KERNEL_OK")
</pallas_src>

<mosaic_0001>
module attributes {stable_mosaic.version = 11 : i64} {
  func.func @mlp_kernel(%arg0: i32, %arg1: memref<8x15xf32, #tpu.memory_space<vmem>>, %arg2: memref<15x32xbf16, #tpu.memory_space<vmem>>, %arg3: memref<1x32xf32, #tpu.memory_space<vmem>>, %arg4: memref<32x4xbf16, #tpu.memory_space<vmem>>, %arg5: memref<1x4xf32, #tpu.memory_space<vmem>>, %arg6: memref<8x4xf32, #tpu.memory_space<vmem>>) attributes {dimension_semantics = [#tpu.dimension_semantics<parallel>], iteration_bounds = array<i64: 2>, scalar_prefetch = 0 : i64, scratch_operands = 0 : i64, tpu.core_type = #tpu.core_type<tc>, window_params = [{transform_indices = @transform_0, window_bounds = array<i64: 8, 15>}, {pipeline_mode = #tpu.pipeline_mode<synchronous>, transform_indices = @transform_1, window_bounds = array<i64: 15, 32>}, {pipeline_mode = #tpu.pipeline_mode<synchronous>, transform_indices = @transform_2, window_bounds = array<i64: 1, 32>}, {pipeline_mode = #tpu.pipeline_mode<synchronous>, transform_indices = @transform_3, window_bounds = array<i64: 32, 4>}, {pipeline_mode = #tpu.pipeline_mode<synchronous>, transform_indices = @transform_4, window_bounds = array<i64: 1, 4>}, {transform_indices = @transform_5, window_bounds = array<i64: 8, 4>}]} {
    %c0 = arith.constant 0 : index
    %c0_0 = arith.constant 0 : index
    %0 = vector.load %arg1[%c0, %c0_0] : memref<8x15xf32, #tpu.memory_space<vmem>>, vector<8x15xf32>
    %1 = arith.truncf %0 : vector<8x15xf32> to vector<8x15xbf16>
    %c0_1 = arith.constant 0 : index
    %c0_2 = arith.constant 0 : index
    %2 = vector.load %arg2[%c0_1, %c0_2] : memref<15x32xbf16, #tpu.memory_space<vmem>>, vector<15x32xbf16>
    %cst = arith.constant dense<0.000000e+00> : vector<8x32xf32>
    %3 = tpu.matmul %1, %2, %cst {dimension_numbers = #tpu.dot_dimension_numbers<[1], [0], [0], [1], [0, 0, 1, 1], [], []>} : vector<8x15xbf16>, vector<15x32xbf16>, vector<8x32xf32> -> vector<8x32xf32>
    %c0_3 = arith.constant 0 : index
    %c0_4 = arith.constant 0 : index
    %4 = vector.load %arg3[%c0_3, %c0_4] : memref<1x32xf32, #tpu.memory_space<vmem>>, vector<1x32xf32>
    %5 = vector.broadcast %4 : vector<1x32xf32> to vector<8x32xf32>
    %6 = arith.addf %3, %5 : vector<8x32xf32>
    %cst_5 = arith.constant 0.000000e+00 : f32
    %7 = vector.broadcast %cst_5 : f32 to vector<8x32xf32>
    %8 = arith.maximumf %6, %7 : vector<8x32xf32>
    %9 = arith.truncf %8 : vector<8x32xf32> to vector<8x32xbf16>
    %c0_6 = arith.constant 0 : index
    %c0_7 = arith.constant 0 : index
    %10 = vector.load %arg4[%c0_6, %c0_7] : memref<32x4xbf16, #tpu.memory_space<vmem>>, vector<32x4xbf16>
    %cst_8 = arith.constant dense<0.000000e+00> : vector<8x4xf32>
    %11 = tpu.matmul %9, %10, %cst_8 {dimension_numbers = #tpu.dot_dimension_numbers<[1], [0], [0], [1], [0, 0, 1, 1], [], []>} : vector<8x32xbf16>, vector<32x4xbf16>, vector<8x4xf32> -> vector<8x4xf32>
    %c0_9 = arith.constant 0 : index
    %c0_10 = arith.constant 0 : index
    %12 = vector.load %arg5[%c0_9, %c0_10] : memref<1x4xf32, #tpu.memory_space<vmem>>, vector<1x4xf32>
    %13 = vector.broadcast %12 : vector<1x4xf32> to vector<8x4xf32>
    %14 = arith.addf %11, %13 : vector<8x4xf32>
    %c0_11 = arith.constant 0 : index
    %c0_12 = arith.constant 0 : index
    %15 = vector.load %arg6[%c0_11, %c0_12] : memref<8x4xf32, #tpu.memory_space<vmem>>, vector<8x4xf32>
    tpu.vector_store %arg6[%c0_11, %c0_12], %14 {strides = array<i32>} : memref<8x4xf32, #tpu.memory_space<vmem>>, vector<8x4xf32>,
    return
  }
  func.func @transform_0(%arg0: i32) -> (i32, i32) {
    %c0_i32 = arith.constant 0 : i32
    %c0_i32_0 = arith.constant 0 : i32
    return %arg0, %c0_i32 : i32, i32
  }
  func.func @transform_1(%arg0: i32) -> (i32, i32) {
    %c0_i32 = arith.constant 0 : i32
    %c0_i32_0 = arith.constant 0 : i32
    %c0_i32_1 = arith.constant 0 : i32
    return %c0_i32, %c0_i32_0 : i32, i32
  }
  func.func @transform_2(%arg0: i32) -> (i32, i32) {
    %c0_i32 = arith.constant 0 : i32
    %c0_i32_0 = arith.constant 0 : i32
    %c0_i32_1 = arith.constant 0 : i32
    return %c0_i32, %c0_i32_0 : i32, i32
  }
  func.func @transform_3(%arg0: i32) -> (i32, i32) {
    %c0_i32 = arith.constant 0 : i32
    %c0_i32_0 = arith.constant 0 : i32
    %c0_i32_1 = arith.constant 0 : i32
    return %c0_i32, %c0_i32_0 : i32, i32
  }
  func.func @transform_4(%arg0: i32) -> (i32, i32) {
    %c0_i32 = arith.constant 0 : i32
    %c0_i32_0 = arith.constant 0 : i32
    %c0_i32_1 = arith.constant 0 : i32
    return %c0_i32, %c0_i32_0 : i32, i32
  }
  func.func @transform_5(%arg0: i32) -> (i32, i32) {
    %c0_i32 = arith.constant 0 : i32
    %c0_i32_0 = arith.constant 0 : i32
    return %arg0, %c0_i32 : i32, i32
  }
}

</mosaic_0001>

<bundles_post_ra>
// kernel: tpu_custom_call.1
= control target key start
LH: loop header
LB: loop body
LE: loop exit
PB: predicated region body
PF: predicated region fallthrough
CT: control target
= control target key end

     0   :  { %10 = vsyncpa [#allocation3], 0  ;;  %s579_s18 = smov 0   ;;  %s647_s0 = inlined_call_operand.vmem [shape: f32[16,15], index: 0, kind: input, shape index: {}]   ;;  %s648_s1 = inlined_call_operand.hbm [shape: bf16[15,32], index: 1, kind: input, shape index: {}]   ;;  %s649_s2 = inlined_call_operand.vmem [shape: f32[1,32], index: 2, kind: input, shape index: {}]   ;;  %s650_s3 = inlined_call_operand.vmem [shape: bf16[32,4], index: 3, kind: input, shape index: {}]   ;;  %s651_s4 = inlined_call_operand.vmem [shape: f32[1,4], index: 4, kind: input, shape index: {}]   ;;  %s652_s5 = inlined_call_operand.vmem [shape: f32[16,4], index: 5, kind: output, shape index: {}]  }
   0x1 LB: > { %s585_s19 = sadd.s32 4294967295, %s541_s18   ;;  %p441_p0 = scmp.ge.s32.totalorder %s541_s18, 1  ;;  %s541_s18 = sphi %s579_s18, %s16_s18  }
   0x2   : > { %p157_p1 = scmp.lt.s32.totalorder %s541_s18, 3  ;;  %s543_s20 = smov [#allocation2]  }
   0x3   : > { %s169_s21 = sshll.u32 %s543_s20, 4  ;;  %p653_p3 = scmp.eq.s32.totalorder %s585_s19, 0  ;;  %s170_s21 = int_to_ptr.vmem [resolvable:$true] %s169_s21 }
   0x4   : > { %p589_p2 = pnand %p441_p0, %p157_p1  ;;  %s503_s26 = scalar_lea.hbm %s648_s1, 128 }
   0x5   : > { %p504_p6 = scmp.ne.s32.totalorder %s648_s1, %s503_s26  ;;  %p510_p10 = scmp.lt.u32.totalorder %s503_s26, %s648_s1 }
   0x6   : > { %s655_s22 = scalar_select %p589_p2, 1, 0 }
   0x7   : > { %p480_p4 = pneg %p589_p2 }
   0x9   : > { %p598_p5 = pnand %p653_p3, %p480_p4 }
   0xb   : > { %p505_p7 = pneg %p598_p5 }
   0xd   : > { %p506_p8 = pnand %p505_p7, %p504_p6 }
   0xf   : > { %p507_p9 = pneg %p506_p8 }
  0x11   : > { %p512_p11 = pnand %p510_p10, %p507_p9 }
  0x13   : > { %515 = shalt.err (!%p512_p11)
}
  0x14   : > { %s516_s6 = scalar_lea.vmem %s170_s21, 128  ;;  %p524_p1 = scmp.lt.s32.totalorder %s170_s21, %s170_s21 }
  0x15   : > { %p517_p12 = scmp.ne.s32.totalorder %s170_s21, %s516_s6  ;;  %p525_p4 = scmp.lt.s32.totalorder %s516_s6, %s516_s6 }
  0x17   : > { %p519_p13 = pnand %p517_p12, %p505_p7  ;;  %p526_p3 = por %p525_p4, %p524_p1 }
  0x19   : > { %p520_p0 = pneg %p519_p13 }
  0x1b   : > { %p527_p2 = pnand %p526_p3, %p520_p0 }
  0x1d   : > { %530 = shalt.err (!%p527_p2)
}
  0x1e   : > { %s544_s7 = smov 64   ;;  %s545_s8 = smov 4  }
  0x1f   : > { %483 = dma.hbm_to_vmem [thread:$0]  (!%p598_p5), %s648_s1, 128, %s170_s21, [#allocation3], %s544_s7, %s544_s7, %s545_s8  }
  0x20   : > { %p657_p6 = scmp.ne.s32.totalorder %s655_s22, 0 }
  0x21   : > { %p658_p8 = scmp.eq.s32.totalorder (!%p657_p6), %s585_s19, 0 }
  0x22   : > { %201 = sbr.rel (%p657_p6) target bundleno = 484 (0x1e4), region = 40 }
  0x29   : > { %536 = dma.done.wait (%p658_p8), [#allocation3], 128   ;;  %p659_p7 = pmov %p658_p8 }
  0x2a   : > { %vm256_vm0 = vcmask 1046528   ;;  %v546_v0 = vmov 0.0   ;;  %p227_p2 = scmp.lt.s32.totalorder %s585_s19, 1  ;;  %vm547_vm1 = vmmov 0   ;;  %vm257_vm2 = vcmask 1047552   ;;  %v500_v4 = vld [vmem:[#allocation2] sm:$0xff]  }
  0x2b   : > { %538 = vsyncadd (%p659_p7), [#allocation3], 4294967168  ;;  %462 = vmatprep.subr.bf16.mxu0 %v546_v0  ;;  %468 = vmatprep.subr.bf16.mxu1 %v546_v0  ;;  %v548_v1 = vmov 65535   ;;  %vm252_vm3 = vcmask 121856   ;;  %v501_v8 = vld [vmem:[%s650_s3] sm:$0xff]   ;;  %v502_v9 = vld [vmem:[%s650_s3 + $0x8] sm:$0xff]  }
  0x2c   : > { %464 = vmatprep.mubr.msk.bf16.mxu0 %vm547_vm1, %v546_v0  ;;  %472 = vmatprep.mubr.msk.bf16.mxu1 %vm547_vm1, %v546_v0  ;;  %v258_v2 = vsel %vm256_vm0, 4294967295, %v548_v1  ;;  %s661_s19 = smov (!%p227_p2, %s585_s19), 1  ;;  %v448_v10 = vld [vmem:[%s649_s2] ss:$0 sm:$0xff]  ;;  %vm328_vm4 = vcmask 261120   ;;  %vm372_vm5 = vcmask 31744  }
  0x2d   : > { %s446_s11 = sshll.u32 %s661_s19, 3  ;;  %v259_v3 = vsel %vm257_vm2, %v258_v2, 0  ;;  %469 = vmatpush3.bf16.msra.mxu1 %v501_v8  ;;  %v451_v18 = vld [vmem:[%s651_s4] ss:$0 sm:$0xff] }
  0x2e   : > { %s230_s14 = scalar_lea.vmem %s647_s0, %s446_s11  ;;  %v261_v6 = vand.u32 %v500_v4, %v259_v3  ;;  %470 = vmatprep.subr.bf16.mxu1 %v546_v0  ;;  %s234_s26 = scalar_lea.vmem %s652_s5, %s446_s11 }
  0x2f   : > { %v236_v5 = vld [vmem:[%s230_s14] sm:$0xff] }
  0x30   : > { %v237_v7 = vpack.c.bf16 %v236_v5, %v236_v5  ;;  %463 = vmatpush3.bf16.msra.mxu0 %v261_v6 }
  0x31   : > { %471 = vmatpush3.bf16.msra.mxu1 %v502_v9 }
  0x33   : > { %465 = vmatmul.mubr.msk.bf16.vlgmr.msra.gmra.mrb[0].mxu0 %vm252_vm3, %v237_v7 }
 0x106   : > { %v297_v11 = vpop.f32.mrb[0].mxu0 }
 0x107   : > { %v298_v12 = vadd.f32 %v448_v10, %v297_v11  ;;  %v466_v13 = vpop.f32.mrb[1].mxu0 }
 0x108   : > { %v300_v14 = vpop.f32.mrb[2].mxu0 }
 0x109   : > { %v303_v15 = vmax.f32 %v298_v12, 0.0  ;;  %v467_v16 = vpop.f32.mrb[3].mxu0 }
 0x10b   : > { %v304_v17 = vpack.c.bf16 %v303_v15, %v303_v15 }
 0x10d   : > { %473 = vmatmul.mubr.msk.bf16.vlgmr.msra.gmra.mrb[0].mxu1 %vm328_vm4, %v304_v17 }
 0x1e0   : > { %v366_v19 = vpop.f32.mrb[0].mxu1 }
 0x1e1   : > { %v367_v20 = vadd.f32 %v451_v18, %v366_v19  ;;  %v474_v21 = vpop.f32.mrb[1].mxu1 }
 0x1e2   : > { %v369_v22 = vpop.f32.mrb[2].mxu1 }
 0x1e3   : > { %373 = vst.msk [vmem:[%s234_s26] sm:$0xff] %vm372_vm5, %v367_v20  ;;  %v475_v23 = vpop.f32.mrb[3].mxu1 }
 0x1e4 PF: > { %s16_s18 = sadd.s32 1, %s541_s18  }
 0x1e5   : > { %p13_p3 = scmp.ge.s32.totalorder %s16_s18, 4  }
 0x1e7   :  { %15 = sbr.rel (!%p13_p3) target bundleno = 1 (0x1), region = 75 }
 0x1ee   :  { %393 = vsyncpa [#allocation3], 1 }
 0x1ef   :  { %395 = vsyncpa [#allocation3 + $0x1], 1 }

</bundles_post_ra>
